<compile_context>
chip_gen: v6e
topology: v6e:2x2x1
jax: 0.10.0
libtpu: 0.0.40
codegen_flags: <defaults>
</compile_context>

<pallas_src>
import functools

import jax
import jax.numpy as jnp
from jax import lax
from jax.experimental import pallas as pl
from jax.experimental.pallas import tpu as pltpu

K_PAD = 48      # conv contraction dim: 42 board cells padded to a sublane multiple
F_CONV = 384    # 32 * 3 * 4 conv features
N_PAD = 128     # lane-dense hidden/output width (42 -> 20 -> 7 live lanes)


# ----------------------------- Pallas kernel ------------------------------ #

def fused_qnet_kernel(x_ref, wc_ref, wfc_ref, bias_ref, o_ref):
    """conv+ReLU -> fc1+ReLU -> fc2+ReLU -> fc3 on one batch tile.

    x:    (TB, 48)   bf16  flattened boards (lanes 42: are zero)
    wc:   (48, 384)  bf16  conv folded to a matmul
    wfc:  (640, 128) bf16  rows [0:384]=fc1.T, [384:512]=fc2.T, [512:640]=fc3.T
    bias: (8, 768)   f32   row0 lanes [0:384]=conv, [384:512]=fc1,
                           [512:640]=fc2, [640:768]=fc3
    o:    (TB, 128)  f32   Q-values live in lanes [0:7]
    """
    h = jnp.dot(x_ref[...], wc_ref[...], preferred_element_type=jnp.float32)
    h = jnp.maximum(h + bias_ref[0:1, 0:384], 0.0)                      # conv + ReLU
    h = jnp.dot(h.astype(jnp.bfloat16), wfc_ref[0:384, :],
                preferred_element_type=jnp.float32)
    h = jnp.maximum(h + bias_ref[0:1, 384:512], 0.0)                    # fc1 + ReLU
    h = jnp.dot(h.astype(jnp.bfloat16), wfc_ref[384:512, :],
                preferred_element_type=jnp.float32)
    h = jnp.maximum(h + bias_ref[0:1, 512:640], 0.0)                    # fc2 + ReLU
    o_ref[...] = (jnp.dot(h.astype(jnp.bfloat16), wfc_ref[512:640, :],
                          preferred_element_type=jnp.float32)
                  + bias_ref[0:1, 640:768])                             # fc3


# ------------------------------ Host wrappers ------------------------------ #

def _round_up(n, m):
    return ((n + m - 1) // m) * m


@functools.lru_cache(maxsize=1)
def _max_tile_b():
    """256-row tiles fill the v6e/v7x 2x256 MXU; 128 suffices on v5e's 4x128."""
    try:
        kind = jax.devices()[0].device_kind.lower()
    except Exception:
        return 256
    return 256 if ("v6" in kind or "v7" in kind or "7x" in kind) else 128


def prepare_params(params):
    """One-time preprocessing: fold conv+flatten into a matrix, pack, bf16-cast."""
    conv_w, conv_b, w1, b1, w2, b2, w3, b3 = params

    # Effective conv matrix: push the 42 unit boards through the conv.  Row =
    # flattened board position (r*7+c); column = PyTorch's flatten order
    # c_out*12 + oh*4 + ow (matches .view(-1, 32*3*4)).
    basis = jnp.eye(42, dtype=jnp.float32).reshape(42, 1, 6, 7)
    w_eff = lax.conv_general_dilated(
        basis, conv_w.astype(jnp.float32), window_strides=(1, 1), padding="VALID",
        dimension_numbers=("NCHW", "OIHW", "NCHW"),
    ).reshape(42, F_CONV)
    b_eff = jnp.repeat(conv_b.astype(jnp.float32), 12)                  # (384,)

    wc = jnp.zeros((K_PAD, F_CONV), jnp.float32).at[:42, :].set(w_eff)

    # fc1/fc2/fc3 weights packed into one lane-128 slab; zero rows/cols keep
    # the padded activation lanes exactly zero through the whole chain.
    wfc = jnp.zeros((640, N_PAD), jnp.float32)
    wfc = wfc.at[0:F_CONV, 0:42].set(w1.T.astype(jnp.float32))
    wfc = wfc.at[384:384 + 42, 0:20].set(w2.T.astype(jnp.float32))
    wfc = wfc.at[512:512 + 20, 0:7].set(w3.T.astype(jnp.float32))

    # All biases in one lane-aligned f32 slab (bias-add stays f32 / v5e-safe).
    bias = jnp.zeros((8, 768), jnp.float32)
    bias = bias.at[0, 0:384].set(b_eff)
    bias = bias.at[0, 384:384 + 42].set(b1.astype(jnp.float32))
    bias = bias.at[0, 512:512 + 20].set(b2.astype(jnp.float32))
    bias = bias.at[0, 640:640 + 7].set(b3.astype(jnp.float32))

    return wc.astype(jnp.bfloat16), wfc.astype(jnp.bfloat16), bias


@jax.jit
def deep_q_forward_batch(boards, prepared):
    """boards: (B, 6, 7) float. Returns (B, 7) Q-values."""
    wc, wfc, bias = prepared
    B = boards.shape[0]
    tile_b = min(_max_tile_b(), _round_up(max(B, 1), 16))
    Bp = _round_up(B, tile_b)

    x = boards.reshape(B, 42).astype(jnp.bfloat16)
    xp = jnp.zeros((Bp, K_PAD), jnp.bfloat16).at[:B, :42].set(x)

    out = pl.pallas_call(
        fused_qnet_kernel,
        out_shape=jax.ShapeDtypeStruct((Bp, N_PAD), jnp.float32),
        grid=(Bp // tile_b,),
        in_specs=[
            pl.BlockSpec((tile_b, K_PAD), lambda b: (b, 0)),   # boards: tiled over batch
            pl.BlockSpec((K_PAD, F_CONV), lambda b: (0, 0)),   # weights stay VMEM-resident
            pl.BlockSpec((640, N_PAD), lambda b: (0, 0)),
            pl.BlockSpec((8, 768), lambda b: (0, 0)),
        ],
        out_specs=pl.BlockSpec((tile_b, N_PAD), lambda b: (b, 0)),
        compiler_params=pltpu.CompilerParams(
            dimension_semantics=("parallel",)),                # 2-TC shard on v7x
    )(xp, wc, wfc, bias)

    return out[:B, :7]


def deep_q_forward(x, prepared):
    """x: (1, 6, 7) board (C, H, W) — exactly the module's forward. Returns (7,)."""
    return deep_q_forward_batch(x.reshape(1, 6, 7), prepared)[0]


# ------------------------------- Reference --------------------------------- #

def init_params(key):
    """Deterministic synthetic parameters with the module's shapes."""
    ks = jax.random.split(key, 8)
    conv_w = jax.random.normal(ks[0], (32, 1, 4, 4), jnp.float32) * 0.10
    conv_b = jax.random.normal(ks[1], (32,), jnp.float32) * 0.10
    w1 = jax.random.normal(ks[2], (42, 384), jnp.float32) * 0.05
    b1 = jax.random.normal(ks[3], (42,), jnp.float32) * 0.05
    w2 = jax.random.normal(ks[4], (20, 42), jnp.float32) * 0.10
    b2 = jax.random.normal(ks[5], (20,), jnp.float32) * 0.10
    w3 = jax.random.normal(ks[6], (7, 20), jnp.float32) * 0.10
    b3 = jax.random.normal(ks[7], (7,), jnp.float32) * 0.10
    return (conv_w, conv_b, w1, b1, w2, b2, w3, b3)


def reference_forward(x, params):
    """Pure-JAX f32 reference replicating the PyTorch forward exactly."""
    conv_w, conv_b, w1, b1, w2, b2, w3, b3 = params
    inp = x[None]                                            # (1, 1, 6, 7) NCHW
    c = lax.conv_general_dilated(
        inp, conv_w, window_strides=(1, 1), padding="VALID",
        dimension_numbers=("NCHW", "OIHW", "NCHW"),
    )                                                        # (1, 32, 3, 4)
    c = jax.nn.relu(c + conv_b[None, :, None, None])
    f = c.reshape(-1, 32 * 3 * 4)                            # (1, 384)
    h = jax.nn.relu(f @ w1.T + b1)
    h = jax.nn.relu(h @ w2.T + b2)
    o = h @ w3.T + b3                                        # (1, 7)
    return o[0]


if __name__ == "__main__":
    key = jax.random.PRNGKey(0)
    k_params, k_x1, k_xb = jax.random.split(key, 3)
    params = init_params(k_params)
    prepared = prepare_params(params)

    # bf16 weights/activations (f32 accumulation) => looser tolerance vs f32 ref.
    TOL = 2e-2

    # 1) Single board, exactly the module's forward: (1, 6, 7) -> (7,).
    x1 = jax.random.normal(k_x1, (1, 6, 7), jnp.float32)
    q1 = jax.block_until_ready(deep_q_forward(x1, prepared))
    q1_ref = reference_forward(x1, params)
    assert q1.shape == (7,)
    assert jnp.allclose(q1, q1_ref, atol=TOL, rtol=TOL), (q1, q1_ref)

    # 2) Small batch (exercises padding + the batched grid path).
    boards = jax.random.normal(k_xb, (5, 6, 7), jnp.float32)
    qb = jax.block_until_ready(deep_q_forward_batch(boards, prepared))
    qb_ref = jax.vmap(lambda b: reference_forward(b[None], params))(boards)
    assert qb.shape == (5, 7)
    assert jnp.allclose(qb, qb_ref, atol=TOL, rtol=TOL), (qb, qb_ref)

    print("KERNEL_OK")
</pallas_src>

<mosaic_0001>
module attributes {stable_mosaic.version = 11 : i64} {
  func.func @fused_qnet_kernel(%arg0: i32, %arg1: memref<16x48xbf16, #tpu.memory_space<vmem>>, %arg2: memref<48x384xbf16, #tpu.memory_space<vmem>>, %arg3: memref<640x128xbf16, #tpu.memory_space<vmem>>, %arg4: memref<8x768xf32, #tpu.memory_space<vmem>>, %arg5: memref<16x128xf32, #tpu.memory_space<vmem>>) attributes {dimension_semantics = [#tpu.dimension_semantics<parallel>], iteration_bounds = array<i64: 1>, scalar_prefetch = 0 : i64, scratch_operands = 0 : i64, tpu.core_type = #tpu.core_type<tc>, window_params = [{transform_indices = @transform_0, window_bounds = array<i64: 16, 48>}, {pipeline_mode = #tpu.pipeline_mode<synchronous>, transform_indices = @transform_1, window_bounds = array<i64: 48, 384>}, {pipeline_mode = #tpu.pipeline_mode<synchronous>, transform_indices = @transform_2, window_bounds = array<i64: 640, 128>}, {pipeline_mode = #tpu.pipeline_mode<synchronous>, transform_indices = @transform_3, window_bounds = array<i64: 8, 768>}, {transform_indices = @transform_4, window_bounds = array<i64: 16, 128>}]} {
    %c0 = arith.constant 0 : index
    %c0_0 = arith.constant 0 : index
    %0 = vector.load %arg1[%c0, %c0_0] : memref<16x48xbf16, #tpu.memory_space<vmem>>, vector<16x48xbf16>
    %c0_1 = arith.constant 0 : index
    %c0_2 = arith.constant 0 : index
    %1 = vector.load %arg2[%c0_1, %c0_2] : memref<48x384xbf16, #tpu.memory_space<vmem>>, vector<48x384xbf16>
    %cst = arith.constant dense<0.000000e+00> : vector<16x384xf32>
    %2 = tpu.matmul %0, %1, %cst {dimension_numbers = #tpu.dot_dimension_numbers<[1], [0], [0], [1], [0, 0, 1, 1], [], []>} : vector<16x48xbf16>, vector<48x384xbf16>, vector<16x384xf32> -> vector<16x384xf32>
    %c0_3 = arith.constant 0 : index
    %c0_4 = arith.constant 0 : index
    %3 = vector.load %arg4[%c0_3, %c0_4] : memref<8x768xf32, #tpu.memory_space<vmem>>, vector<1x384xf32>
    %4 = vector.broadcast %3 : vector<1x384xf32> to vector<16x384xf32>
    %5 = arith.addf %2, %4 : vector<16x384xf32>
    %cst_5 = arith.constant 0.000000e+00 : f32
    %6 = vector.broadcast %cst_5 : f32 to vector<16x384xf32>
    %7 = arith.maximumf %5, %6 : vector<16x384xf32>
    %8 = arith.truncf %7 : vector<16x384xf32> to vector<16x384xbf16>
    %c0_6 = arith.constant 0 : index
    %c0_7 = arith.constant 0 : index
    %9 = vector.load %arg3[%c0_6, %c0_7] : memref<640x128xbf16, #tpu.memory_space<vmem>>, vector<384x128xbf16>
    %cst_8 = arith.constant dense<0.000000e+00> : vector<16x128xf32>
    %10 = tpu.matmul %8, %9, %cst_8 {dimension_numbers = #tpu.dot_dimension_numbers<[1], [0], [0], [1], [0, 0, 1, 1], [], []>} : vector<16x384xbf16>, vector<384x128xbf16>, vector<16x128xf32> -> vector<16x128xf32>
    %c0_9 = arith.constant 0 : index
    %c384 = arith.constant 384 : index
    %11 = vector.load %arg4[%c0_9, %c384] : memref<8x768xf32, #tpu.memory_space<vmem>>, vector<1x128xf32>
    %12 = vector.broadcast %11 : vector<1x128xf32> to vector<16x128xf32>
    %13 = arith.addf %10, %12 : vector<16x128xf32>
    %cst_10 = arith.constant 0.000000e+00 : f32
    %14 = vector.broadcast %cst_10 : f32 to vector<16x128xf32>
    %15 = arith.maximumf %13, %14 : vector<16x128xf32>
    %16 = arith.truncf %15 : vector<16x128xf32> to vector<16x128xbf16>
    %c384_11 = arith.constant 384 : index
    %c0_12 = arith.constant 0 : index
    %17 = vector.load %arg3[%c384_11, %c0_12] : memref<640x128xbf16, #tpu.memory_space<vmem>>, vector<128x128xbf16>
    %cst_13 = arith.constant dense<0.000000e+00> : vector<16x128xf32>
    %18 = tpu.matmul %16, %17, %cst_13 {dimension_numbers = #tpu.dot_dimension_numbers<[1], [0], [0], [1], [0, 0, 1, 1], [], []>} : vector<16x128xbf16>, vector<128x128xbf16>, vector<16x128xf32> -> vector<16x128xf32>
    %c0_14 = arith.constant 0 : index
    %c512 = arith.constant 512 : index
    %19 = vector.load %arg4[%c0_14, %c512] : memref<8x768xf32, #tpu.memory_space<vmem>>, vector<1x128xf32>
    %20 = vector.broadcast %19 : vector<1x128xf32> to vector<16x128xf32>
    %21 = arith.addf %18, %20 : vector<16x128xf32>
    %cst_15 = arith.constant 0.000000e+00 : f32
    %22 = vector.broadcast %cst_15 : f32 to vector<16x128xf32>
    %23 = arith.maximumf %21, %22 : vector<16x128xf32>
    %24 = arith.truncf %23 : vector<16x128xf32> to vector<16x128xbf16>
    %c512_16 = arith.constant 512 : index
    %c0_17 = arith.constant 0 : index
    %25 = vector.load %arg3[%c512_16, %c0_17] : memref<640x128xbf16, #tpu.memory_space<vmem>>, vector<128x128xbf16>
    %cst_18 = arith.constant dense<0.000000e+00> : vector<16x128xf32>
    %26 = tpu.matmul %24, %25, %cst_18 {dimension_numbers = #tpu.dot_dimension_numbers<[1], [0], [0], [1], [0, 0, 1, 1], [], []>} : vector<16x128xbf16>, vector<128x128xbf16>, vector<16x128xf32> -> vector<16x128xf32>
    %c0_19 = arith.constant 0 : index
    %c640 = arith.constant 640 : index
    %27 = vector.load %arg4[%c0_19, %c640] : memref<8x768xf32, #tpu.memory_space<vmem>>, vector<1x128xf32>
    %28 = vector.broadcast %27 : vector<1x128xf32> to vector<16x128xf32>
    %29 = arith.addf %26, %28 : vector<16x128xf32>
    %c0_20 = arith.constant 0 : index
    %c0_21 = arith.constant 0 : index
    %30 = vector.load %arg5[%c0_20, %c0_21] : memref<16x128xf32, #tpu.memory_space<vmem>>, vector<16x128xf32>
    tpu.vector_store %arg5[%c0_20, %c0_21], %29 {strides = array<i32>} : memref<16x128xf32, #tpu.memory_space<vmem>>, vector<16x128xf32>,
    return
  }
  func.func @transform_0(%arg0: i32) -> (i32, i32) {
    %c0_i32 = arith.constant 0 : i32
    %c0_i32_0 = arith.constant 0 : i32
    return %arg0, %c0_i32 : i32, i32
  }
  func.func @transform_1(%arg0: i32) -> (i32, i32) {
    %c0_i32 = arith.constant 0 : i32
    %c0_i32_0 = arith.constant 0 : i32
    %c0_i32_1 = arith.constant 0 : i32
    return %c0_i32, %c0_i32_0 : i32, i32
  }
  func.func @transform_2(%arg0: i32) -> (i32, i32) {
    %c0_i32 = arith.constant 0 : i32
    %c0_i32_0 = arith.constant 0 : i32
    %c0_i32_1 = arith.constant 0 : i32
    return %c0_i32, %c0_i32_0 : i32, i32
  }
  func.func @transform_3(%arg0: i32) -> (i32, i32) {
    %c0_i32 = arith.constant 0 : i32
    %c0_i32_0 = arith.constant 0 : i32
    %c0_i32_1 = arith.constant 0 : i32
    return %c0_i32, %c0_i32_0 : i32, i32
  }
  func.func @transform_4(%arg0: i32) -> (i32, i32) {
    %c0_i32 = arith.constant 0 : i32
    %c0_i32_0 = arith.constant 0 : i32
    return %arg0, %c0_i32 : i32, i32
  }
}

</mosaic_0001>

<bundles_post_ra>
// kernel: deep_q_forward_batch.1
= control target key start
LH: loop header
LB: loop body
LE: loop exit
PB: predicated region body
PF: predicated region fallthrough
CT: control target
= control target key end

     0   :  { %9 = vsyncpa [#allocation3], 0  ;;  %s1129_s0 = inlined_call_operand.vmem [shape: bf16[16,48], index: 0, kind: input, shape index: {}]   ;;  %s1130_s1 = inlined_call_operand.hbm [shape: bf16[48,384], index: 1, kind: input, shape index: {}]   ;;  %s1131_s2 = inlined_call_operand.hbm [shape: bf16[640,128], index: 2, kind: input, shape index: {}]   ;;  %s1132_s3 = inlined_call_operand.hbm [shape: f32[8,768], index: 3, kind: input, shape index: {}]   ;;  %s1133_s4 = inlined_call_operand.vmem [shape: f32[16,128], index: 4, kind: output, shape index: {}]  }
   0x1   :  { %10 = vsyncpa [#allocation5], 0  ;;  %s1041_s15 = smov [#allocation4]  }
   0x2   :  { %s30_s16 = sshll.u32 %s1041_s15, 4  ;;  %s31_s16 = int_to_ptr.vmem [resolvable:$true] %s30_s16 }
   0x3   :  { %s985_s17 = scalar_lea.vmem %s31_s16, 5120  ;;  %p990_p1 = scmp.lt.s32.totalorder %s31_s16, %s31_s16 }
   0x4   :  { %p986_p0 = scmp.ne.s32.totalorder %s31_s16, %s985_s17  ;;  %p991_p2 = scmp.lt.s32.totalorder %s985_s17, %s985_s17 }
   0x6   :  { %p992_p3 = por %p991_p2, %p990_p1 }
   0x8   :  { %p993_p4 = pnand %p992_p3, %p986_p0 }
   0xa   :  { %996 = shalt.err (!%p993_p4)
}
   0xb   :  { %s1042_s18 = smov 64   ;;  %s1043_s19 = smov 4  }
   0xc   :  { %36 = dma.hbm_to_vmem [thread:$0]  %s1131_s2, 5120, %s31_s16, [#allocation5], %s1042_s18, %s1042_s18, %s1043_s19  }
   0xd   :  { %s1044_s22 = smov [#allocation2]  }
   0xe   :  { %s18_s23 = sshll.u32 %s1044_s22, 4  ;;  %s19_s23 = int_to_ptr.vmem [resolvable:$true] %s18_s23 }
   0xf   :  { %s1005_s24 = scalar_lea.vmem %s19_s23, 1152  ;;  %p1010_p6 = scmp.lt.s32.totalorder %s19_s23, %s19_s23 }
  0x10   :  { %p1006_p5 = scmp.ne.s32.totalorder %s19_s23, %s1005_s24  ;;  %p1011_p7 = scmp.lt.s32.totalorder %s1005_s24, %s1005_s24 }
  0x12   :  { %p1012_p8 = por %p1011_p7, %p1010_p6 }
  0x14   :  { %p1013_p9 = pnand %p1012_p8, %p1006_p5 }
  0x16   :  { %1016 = shalt.err (!%p1013_p9)
}
  0x17   :  { %s1045_s25 = smov 192   ;;  %s1046_s26 = smov 12  }
  0x18   :  { %24 = dma.hbm_to_vmem [thread:$0]  %s1130_s1, 1152, %s19_s23, [#allocation3], %s1045_s25, %s1045_s25, %s1046_s26  }
  0x19   :  { %s1047_s29 = smov [#allocation6]  }
  0x1a   :  { %s43_s30 = sshll.u32 %s1047_s29, 4  ;;  %s44_s30 = int_to_ptr.vmem [resolvable:$true] %s43_s30 }
  0x1b   :  { %s1025_s2 = scalar_lea.vmem %s44_s30, 768  ;;  %p1030_p11 = scmp.lt.s32.totalorder %s44_s30, %s44_s30 }
  0x1c   :  { %p1026_p10 = scmp.ne.s32.totalorder %s44_s30, %s1025_s2  ;;  %p1031_p12 = scmp.lt.s32.totalorder %s1025_s2, %s1025_s2 }
  0x1e   :  { %p1032_p13 = por %p1031_p12, %p1030_p11 }
  0x20   :  { %p1033_p0 = pnand %p1032_p13, %p1026_p10 }
  0x22   :  { %1036 = shalt.err (!%p1033_p0)
}
  0x23   :  { %46 = dma.hbm_to_vmem [thread:$0]  %s1132_s3, 768, %s44_s30, [#allocation5]  }
  0x24   :  { %1037 = dma.done.wait [#allocation3], 1152  }
  0x25   :  { %1038 = vsyncadd [#allocation3], 4294966144 }
  0x26   :  { %1039 = dma.done.wait [#allocation5], 5888  }
  0x27   :  { %1040 = vsyncadd [#allocation5], 4294961408  ;;  %v1048_v0 = vmov 0.0   ;;  %vm1049_vm0 = vmmov 0   ;;  %v1050_v1 = vmov 0   ;;  %v938_v11 = vld [vmem:[#allocation4 + $0x78] sm:$0xff]   ;;  %v73_v36 = vlaneseq }
  0x28   :  { %844 = vmatprep.subr.bf16.mxu1 %v1048_v0  ;;  %850 = vmatprep.mubr.msk.bf16.mxu1 %vm1049_vm0, %v1048_v0  ;;  %v924_v2 = vld [vmem:[#allocation2 + $0x34] ss:$12 sps:$4 sm:$0xff]   ;;  %v926_v3 = vld [vmem:[#allocation2 + $0x38] ss:$12 sps:$4 sm:$0xff]   ;;  %v927_v4 = vld [vmem:[#allocation2 + $0x30] ss:$12 sps:$4 sm:$0xff]  }
  0x29   :  { %177 = vmatprep.mubr.bf16.mxu0 %v1050_v1  ;;  %155 = vmatprep.subr.bf16.mxu0 %v924_v2  ;;  %v928_v5 = vld [vmem:[#allocation2 + $0x1c] ss:$12 sps:$4 sm:$0xff]   ;;  %v930_v6 = vld [vmem:[#allocation2 + $0x20] ss:$12 sps:$4 sm:$0xff]   ;;  %v931_v7 = vld [vmem:[#allocation2 + $0x18] ss:$12 sps:$4 sm:$0xff]  }
  0x2a   :  { %845 = vmatpush3.bf16.msra.mxu1 %v926_v3  ;;  %156 = vmatpush1.bf16.msra.mxu0 %v927_v4  ;;  %v932_v8 = vld [vmem:[#allocation2 + $0x4] ss:$12 sps:$4 sm:$0xff]   ;;  %v934_v9 = vld [vmem:[#allocation2 + $0x8] ss:$12 sps:$4 sm:$0xff]   ;;  %v935_v10 = vld [vmem:[#allocation2] ss:$12 sps:$4 sm:$0xff]  }
  0x2b   :  { %846 = vmatprep.subr.bf16.mxu1 %v1048_v0  ;;  %157 = vmatprep.subr.bf16.mxu0 %v928_v5  ;;  %v936_v12 = vld [vmem:[%s1129_s0] sm:$0xff]   ;;  %vm141_vm1 = vcmask 392192   ;;  %v941_v15 = vld [vmem:[#allocation4 + $0x70] sm:$0xff]   ;;  %v944_v18 = vld [vmem:[#allocation4 + $0x68] sm:$0xff]   ;;  %v74_v37 = vshrl.u32 %v73_v36, 7 }
  0x2c   :  { %v937_v13 = vld [vmem:[#allocation4 + $0xb8] sm:$0xff]   ;;  %v940_v16 = vld [vmem:[#allocation4 + $0xb0] sm:$0xff]   ;;  %v943_v19 = vld [vmem:[#allocation4 + $0xa8] sm:$0xff]  }
  0x2d   :  { %v939_v14 = vld [vmem:[#allocation4 + $0x38] sm:$0xff]   ;;  %v942_v17 = vld [vmem:[#allocation4 + $0x30] sm:$0xff]   ;;  %v945_v20 = vld [vmem:[#allocation4 + $0x28] sm:$0xff]   ;;  %v83_v38 = vsub.s32 2, %v74_v37  ;;  %v79_v41 = vsub.s32 1, %v74_v37  ;;  %v75_v42 = vsub.s32 0, %v74_v37 }
  0x2e   :  { %847 = vmatpush3.bf16.msra.mxu1 %v930_v6  ;;  %158 = vmatpush1.bf16.msra.mxu0 %v931_v7  ;;  %v947_v21 = vld [vmem:[#allocation4 + $0x60] sm:$0xff]   ;;  %v950_v24 = vld [vmem:[#allocation4 + $0x58] sm:$0xff]   ;;  %v952_v27 = vld [vmem:[#allocation4 + $0x90] sm:$0xff]  }
  0x2f   :  { %848 = vmatprep.subr.bf16.mxu1 %v1048_v0  ;;  %159 = vmatprep.subr.bf16.mxu0 %v932_v8  ;;  %v946_v22 = vld [vmem:[#allocation4 + $0xa0] sm:$0xff]   ;;  %v949_v25 = vld [vmem:[#allocation4 + $0x98] sm:$0xff]   ;;  %v953_v28 = vld [vmem:[#allocation4 + $0x50] sm:$0xff]  }
  0x30   :  { %v948_v23 = vld [vmem:[#allocation4 + $0x20] sm:$0xff]   ;;  %v951_v26 = vld [vmem:[#allocation4 + $0x18] sm:$0xff]   ;;  %v954_v29 = vld [vmem:[#allocation4 + $0x10] sm:$0xff]  }
  0x31   :  { %v955_v30 = vld [vmem:[#allocation4 + $0x88] sm:$0xff]   ;;  %v958_v33 = vld [vmem:[#allocation4 + $0x80] sm:$0xff]   ;;  %v961_v4 = vld [vmem:[#allocation4 + $0xf8] sm:$0xff]  }
  0x32   :  { %849 = vmatpush3.bf16.msra.mxu1 %v934_v9  ;;  %160 = vmatpush1.bf16.msra.mxu0 %v935_v10  ;;  %v956_v31 = vld [vmem:[#allocation4 + $0x48] sm:$0xff]   ;;  %v959_v34 = vld [vmem:[#allocation4 + $0x40] sm:$0xff]   ;;  %v962_v6 = vld [vmem:[#allocation4 + $0xf0] sm:$0xff]  }
  0x33   :  { %854 = vmatprep.subr.bf16.mxu1 %v1048_v0  ;;  %795 = vmatprep.subr.bf16.mxu0 %v938_v11  ;;  %v957_v32 = vld [vmem:[#allocation4 + $0x8] sm:$0xff]   ;;  %v960_v35 = vld [vmem:[#allocation4] sm:$0xff]   ;;  %v965_v9 = vld [vmem:[#allocation4 + $0xd8] sm:$0xff]  }
  0x34   :  { %v71_v39 = vld [vmem:[#allocation6] ss:$8 sm:$0x7] }
  0x35   :  { %851 = vmatmul.mubr.msk.bf16.vlgmr.msra.gmra.mxu1 %vm141_vm1, %v936_v12  ;;  %749 = vmatmul.mubr.msk.bf16.vlgmr.msra.gmra.mxu0 %vm141_vm1, %v936_v12  ;;  %v84_v40 = vrot.slane %v71_v39, %v83_v38  ;;  %v80_v47 = vrot.slane %v71_v39, %v79_v41  ;;  %v76_v48 = vrot.slane %v71_v39, %v75_v42  ;;  %v963_v7 = vld [vmem:[#allocation4 + $0xe8] sm:$0xff]   ;;  %v964_v8 = vld [vmem:[#allocation4 + $0xe0] sm:$0xff]   ;;  %v966_v10 = vld [vmem:[#allocation4 + $0xd0] sm:$0xff]  }
  0x36   :  { %855 = vmatpush3.bf16.msra.mxu1 %v937_v13  ;;  %796 = vmatpush3.bf16.msra.mxu0 %v939_v14  ;;  %v967_v11 = vld [vmem:[#allocation4 + $0xc8] sm:$0xff]   ;;  %v968_v12 = vld [vmem:[#allocation4 + $0xc0] sm:$0xff]   ;;  %v969_v13 = vld [vmem:[#allocation4 + $0x138] sm:$0xff]  }
  0x37   :  { %856 = vmatprep.subr.bf16.mxu1 %v1048_v0  ;;  %797 = vmatprep.subr.bf16.mxu0 %v941_v15  ;;  %v970_v14 = vld [vmem:[#allocation4 + $0x130] sm:$0xff]   ;;  %v971_v15 = vld [vmem:[#allocation4 + $0x128] sm:$0xff]   ;;  %v976_v38 = vld [vmem:[#allocation4 + $0x100] sm:$0xff]  }
  0x38   :  { %870 = vmatprep.mubr.msk.bf16.mxu1 %vm1049_vm0, %v1048_v0  ;;  %v974_v36 = vld [vmem:[#allocation4 + $0x110] sm:$0xff]   ;;  %v975_v37 = vld [vmem:[#allocation4 + $0x108] sm:$0xff]   ;;  %v532_v39 = vld [vmem:[#allocation6 + $0x20] ss:$0 sm:$0xff] }
  0x3a   :  { %857 = vmatpush3.bf16.msra.mxu1 %v940_v16  ;;  %798 = vmatpush3.bf16.msra.mxu0 %v942_v17  ;;  %v972_v16 = vld [vmem:[#allocation4 + $0x120] sm:$0xff]   ;;  %v973_v17 = vld [vmem:[#allocation4 + $0x118] sm:$0xff]  }
  0x3b   :  { %858 = vmatprep.subr.bf16.mxu1 %v1048_v0  ;;  %799 = vmatprep.subr.bf16.mxu0 %v944_v18 }
  0x3e   :  { %859 = vmatpush3.bf16.msra.mxu1 %v943_v19  ;;  %800 = vmatpush3.bf16.msra.mxu0 %v945_v20 }
  0x3f   :  { %860 = vmatprep.subr.bf16.mxu1 %v1048_v0  ;;  %801 = vmatprep.subr.bf16.mxu0 %v947_v21 }
  0x42   :  { %861 = vmatpush3.bf16.msra.mxu1 %v946_v22  ;;  %802 = vmatpush3.bf16.msra.mxu0 %v948_v23  ;;  %v286_v22 = vld [vmem:[#allocation6 + $0x18] ss:$0 sm:$0xff] }
  0x43   :  { %862 = vmatprep.subr.bf16.mxu1 %v1048_v0  ;;  %803 = vmatprep.subr.bf16.mxu0 %v950_v24 }
  0x46   :  { %863 = vmatpush3.bf16.msra.mxu1 %v949_v25  ;;  %804 = vmatpush3.bf16.msra.mxu0 %v951_v26 }
  0x47   :  { %864 = vmatprep.subr.bf16.mxu1 %v1048_v0  ;;  %805 = vmatprep.subr.bf16.mxu0 %v953_v28 }
  0x4a   :  { %865 = vmatpush3.bf16.msra.mxu1 %v952_v27  ;;  %806 = vmatpush3.bf16.msra.mxu0 %v954_v29 }
  0x4b   :  { %866 = vmatprep.subr.bf16.mxu1 %v1048_v0  ;;  %807 = vmatprep.subr.bf16.mxu0 %v956_v31 }
  0x4e   :  { %867 = vmatpush3.bf16.msra.mxu1 %v955_v30  ;;  %808 = vmatpush3.bf16.msra.mxu0 %v957_v32 }
  0x4f   :  { %868 = vmatprep.subr.bf16.mxu1 %v1048_v0  ;;  %809 = vmatprep.subr.bf16.mxu0 %v959_v34 }
  0x52   :  { %869 = vmatpush3.bf16.msra.mxu1 %v958_v33  ;;  %810 = vmatpush3.bf16.msra.mxu0 %v960_v35 }
  0x53   :  { %894 = vmatprep.subr.bf16.mxu1 %v1048_v0  ;;  %874 = vmatprep.subr.bf16.mxu0 %v1048_v0 }
  0xf5   :  { %v222_v43 = vpop.f32.mrf.mxu1  ;;  %v179_v45 = vpop.f32.mrf.mxu0 }
  0xf6   :  { %v223_v44 = vadd.f32 %v222_v43, %v84_v40  ;;  %v180_v57 = vadd.f32 %v179_v45, %v76_v48 }
  0xf7   :  { %v852_v46 = vpop.f32.mrf.mxu1  ;;  %v181_v49 = vpop.f32.mrf.mxu0 }
  0xf8   :  { %v231_v51 = vmax.f32 %v223_v44, 0.0  ;;  %v182_v54 = vadd.f32 %v181_v49, %v80_v47  ;;  %v229_v2 = vmax.f32 %v180_v57, 0.0  ;;  %v641_v49 = vld [vmem:[#allocation6 + $0x28] ss:$0 sm:$0xff] }
  0xf9   :  { %v225_v50 = vpop.f32.mrf.mxu1  ;;  %v183_v53 = vpop.f32.mrf.mxu0 }
  0xfa   :  { %v226_v52 = vadd.f32 %v225_v50, %v84_v40  ;;  %v184_v55 = vadd.f32 %v183_v53, %v76_v48  ;;  %v230_v63 = vmax.f32 %v182_v54, 0.0 }
  0xfb   :  { %v853_v56 = vpop.f32.mrf.mxu1  ;;  %v185_v59 = vpop.f32.mrf.mxu0 }
  0xfc   :  { %v234_v58 = vmax.f32 %v226_v52, 0.0  ;;  %v186_v60 = vadd.f32 %v185_v59, %v80_v47  ;;  %v232_v62 = vmax.f32 %v184_v55, 0.0 }
  0xfe   :  { %v237_v61 = vpack.c.bf16 %v234_v58, %v231_v51  ;;  %v233_v1 = vmax.f32 %v186_v60, 0.0  ;;  %v235_v5 = vpack.c.bf16 %v232_v62, %v229_v2 }
 0x100   :  { %871 = vmatmul.mubr.bf16.vlgmr.msra.gmra.mxu1 %v237_v61  ;;  %v236_v3 = vpack.c.bf16 %v233_v1, %v230_v63 }
 0x101   :  { %910 = vmatprep.mubr.msk.bf16.mxu1 %vm1049_vm0, %v1048_v0  ;;  %895 = vmatpush3.bf16.msra.mxu1 %v969_v13 }
 0x102   :  { %463 = vmatprep.mubr.bf16.mxu0 %v236_v3  ;;  %896 = vmatprep.subr.bf16.mxu1 %v1048_v0 }
 0x103   :  { %464 = vmatmul.mubr.bf16.vlgmr.msra.gmra.mxu0 %v235_v5 }
 0x104   :  { %875 = vmatpush3.bf16.msra.mxu0 %v961_v4  ;;  %890 = vmatprep.mubr.msk.bf16.mxu0 %vm1049_vm0, %v1048_v0 }
 0x105   :  { %876 = vmatprep.subr.bf16.mxu0 %v1048_v0  ;;  %897 = vmatpush3.bf16.msra.mxu1 %v970_v14 }
 0x106   :  { %898 = vmatprep.subr.bf16.mxu1 %v1048_v0 }
 0x108   :  { %877 = vmatpush3.bf16.msra.mxu0 %v962_v6 }
 0x109   :  { %878 = vmatprep.subr.bf16.mxu0 %v1048_v0  ;;  %899 = vmatpush3.bf16.msra.mxu1 %v971_v15 }
 0x10a   :  { %900 = vmatprep.subr.bf16.mxu1 %v1048_v0 }
 0x10c   :  { %879 = vmatpush3.bf16.msra.mxu0 %v963_v7 }
 0x10d   :  { %880 = vmatprep.subr.bf16.mxu0 %v1048_v0  ;;  %901 = vmatpush3.bf16.msra.mxu1 %v972_v16 }
 0x10e   :  { %902 = vmatprep.subr.bf16.mxu1 %v1048_v0 }
 0x110   :  { %881 = vmatpush3.bf16.msra.mxu0 %v964_v8 }
 0x111   :  { %882 = vmatprep.subr.bf16.mxu0 %v1048_v0  ;;  %903 = vmatpush3.bf16.msra.mxu1 %v973_v17 }
 0x112   :  { %904 = vmatprep.subr.bf16.mxu1 %v1048_v0 }
 0x114   :  { %883 = vmatpush3.bf16.msra.mxu0 %v965_v9 }
 0x115   :  { %884 = vmatprep.subr.bf16.mxu0 %v1048_v0  ;;  %905 = vmatpush3.bf16.msra.mxu1 %v974_v36 }
 0x116   :  { %906 = vmatprep.subr.bf16.mxu1 %v1048_v0 }
 0x118   :  { %885 = vmatpush3.bf16.msra.mxu0 %v966_v10 }
 0x119   :  { %886 = vmatprep.subr.bf16.mxu0 %v1048_v0  ;;  %907 = vmatpush3.bf16.msra.mxu1 %v975_v37 }
 0x11a   :  { %908 = vmatprep.subr.bf16.mxu1 %v1048_v0 }
 0x11c   :  { %887 = vmatpush3.bf16.msra.mxu0 %v967_v11 }
 0x11d   :  { %888 = vmatprep.subr.bf16.mxu0 %v1048_v0  ;;  %909 = vmatpush3.bf16.msra.mxu1 %v976_v38 }
 0x120   :  { %889 = vmatpush3.bf16.msra.mxu0 %v968_v12 }
 0x1c0   :  { %v506_v18 = vpop.f32.mrf.mxu1 }
 0x1c2   :  { %v872_v19 = vpop.f32.mrf.mxu1 }
 0x1c3   :  { %v811_v20 = vpop.f32.mrf.mxu0 }
 0x1c4   :  { %v509_v21 = vpop.f32.mrf.mxu1 }
 0x1c5   :  { %v812_v23 = vpop.f32.mrf.mxu0 }
 0x1c6   :  { %v873_v24 = vpop.f32.mrf.mxu1  ;;  %v813_v25 = vadd.f32 %v812_v23, %v811_v20 }
 0x1c7   :  { %v814_v26 = vpop.f32.mrf.mxu0 }
 0x1c8   :  { %v466_v27 = vadd.f32 %v813_v25, %v286_v22 }
 0x1c9   :  { %v815_v28 = vpop.f32.mrf.mxu0 }
 0x1ca   :  { %v816_v29 = vadd.f32 %v815_v28, %v814_v26  ;;  %v507_v30 = vadd.f32 %v506_v18, %v466_v27 }
 0x1cc   :  { %v469_v31 = vadd.f32 %v816_v29, %v286_v22  ;;  %v513_v33 = vmax.f32 %v507_v30, 0.0 }
 0x1ce   :  { %v510_v32 = vadd.f32 %v509_v21, %v469_v31 }
 0x1d0   :  { %v514_v34 = vmax.f32 %v510_v32, 0.0 }
 0x1d2   :  { %v515_v35 = vpack.c.bf16 %v514_v34, %v513_v33 }
 0x1d4   :  { %891 = vmatmul.mubr.bf16.vlgmr.msra.gmra.mxu0 %v515_v35 }
 0x294   :  { %v615_v40 = vpop.f32.mrf.mxu0 }
 0x295   :  { %v616_v42 = vadd.f32 %v615_v40, %v532_v39 }
 0x296   :  { %v892_v41 = vpop.f32.mrf.mxu0 }
 0x297   :  { %v622_v46 = vmax.f32 %v616_v42, 0.0 }
 0x298   :  { %v618_v43 = vpop.f32.mrf.mxu0 }
 0x299   :  { %v619_v44 = vadd.f32 %v618_v43, %v532_v39 }
 0x29a   :  { %v893_v45 = vpop.f32.mrf.mxu0 }
 0x29b   :  { %v623_v47 = vmax.f32 %v619_v44, 0.0 }
 0x29d   :  { %v624_v48 = vpack.c.bf16 %v623_v47, %v622_v46 }
 0x29f   :  { %911 = vmatmul.mubr.bf16.vlgmr.msra.gmra.mxu1 %v624_v48 }
 0x35f   :  { %v724_v50 = vpop.f32.mrf.mxu1 }
 0x360   :  { %v725_v51 = vadd.f32 %v724_v50, %v641_v49 }
 0x361   :  { %v912_v52 = vpop.f32.mrf.mxu1 }
 0x362   :  { %731 = vst [vmem:[%s1133_s4] sm:$0xff] %v725_v51 }
 0x363   :  { %v727_v0 = vpop.f32.mrf.mxu1 }
 0x364   :  { %v728_v53 = vadd.f32 %v727_v0, %v641_v49 }
 0x365   :  { %v913_v54 = vpop.f32.mrf.mxu1 }
 0x366   :  { %732 = vst [vmem:[%s1133_s4 + $0x8] sm:$0xff] %v728_v53 }
 0x367   :  { %737 = vsyncpa [#allocation3], 1 }
 0x368   :  { %738 = vsyncpa [#allocation5], 1 }

</bundles_post_ra>
